<compile_context>
chip_gen: v7x
topology: tpu7x:2x2x1
jax: 0.10.0
libtpu: 0.0.40
codegen_flags: <defaults>
</compile_context>

<pallas_src>
import functools
import math

import jax
import jax.numpy as jnp
from jax import lax
from jax.experimental import pallas as pl
from jax.experimental.pallas import tpu as pltpu

_INV_SQRT2 = 1.0 / math.sqrt(2.0)


# ---------------------------------------------------------------------------
# Kernels
# ---------------------------------------------------------------------------

def _gelu(h, approximate):
    if approximate:
        # tanh-approx GELU: tanh/exp run on the EUP slot, free alongside the
        # MXU (opt-in; slight numerics change vs torch's exact GELU).
        return jax.nn.gelu(h, approximate=True)
    # Exact (erf-based) GELU in f32, matching torch.nn.GELU() default.
    return 0.5 * h * (1.0 + lax.erf(h * _INV_SQRT2))


def _mlp_kernel_resident(x_ref, w1_ref, b1_ref, w2_ref, b2_ref, o_ref, *,
                         approx_gelu, matmul_dtype):
    """One row tile; weights are fully VMEM-resident (no hidden reduction)."""
    cast = (lambda a: a.astype(matmul_dtype)) if matmul_dtype is not None else (lambda a: a)

    h = jnp.dot(cast(x_ref[...]), cast(w1_ref[...]),
                preferred_element_type=jnp.float32)
    h = h + b1_ref[...].astype(jnp.float32)
    h = _gelu(h, approx_gelu)

    h2_dtype = matmul_dtype if matmul_dtype is not None else w2_ref.dtype
    y = jnp.dot(h.astype(h2_dtype), cast(w2_ref[...]),
                preferred_element_type=jnp.float32)
    # TODO(synk): dropout is identity (eval semantics); a training version
    # would need pltpu.prng_seed / prng_random_bits masking.
    o_ref[...] = (y + b2_ref[...].astype(jnp.float32)).astype(o_ref.dtype)


def _mlp_kernel_tiled(x_ref, w1_ref, b1_ref, w2_ref, b2_ref, o_ref, acc_ref, *,
                      approx_gelu, matmul_dtype):
    """One (row tile i, hidden tile k) step with an f32 VMEM accumulator."""
    k = pl.program_id(1)
    cast = (lambda a: a.astype(matmul_dtype)) if matmul_dtype is not None else (lambda a: a)

    @pl.when(k == 0)
    def _():
        acc_ref[...] = jnp.zeros_like(acc_ref)

    h = jnp.dot(cast(x_ref[...]), cast(w1_ref[...]),
                preferred_element_type=jnp.float32)
    h = h + b1_ref[...].astype(jnp.float32)
    h = _gelu(h, approx_gelu)

    h2_dtype = matmul_dtype if matmul_dtype is not None else w2_ref.dtype
    acc_ref[...] += jnp.dot(h.astype(h2_dtype), cast(w2_ref[...]),
                            preferred_element_type=jnp.float32)

    @pl.when(k == pl.num_programs(1) - 1)
    def _():
        # TODO(synk): dropout is identity (eval semantics).
        o_ref[...] = (acc_ref[...] + b2_ref[...].astype(jnp.float32)
                      ).astype(o_ref.dtype)


# ---------------------------------------------------------------------------
# Configuration (chip-aware tiling)
# ---------------------------------------------------------------------------

def _round_up(x, m):
    return ((x + m - 1) // m) * m


def _vmem_info():
    """(physical VMEM bytes, scoped-VMEM limit to request)."""
    try:
        cap = int(pltpu.get_tpu_info().vmem_capacity_bytes)
        if cap <= (64 << 20):          # v7x-class: 64 MiB per TensorCore
            limit = cap - (8 << 20)    # leave headroom for compiler scratch
        else:                          # v5e / v6e: 128 MiB
            limit = cap - (16 << 20)
    except Exception:
        # Conservative fallback that is safe on every generation.
        cap, limit = 64 << 20, 56 << 20
    return cap, limit


def _pick_row_tile(M, tm_target):
    if M >= tm_target:
        return tm_target
    if M <= 256:
        return _round_up(M, 16)        # >=16 for bf16 sublane packing
    return min(tm_target, _round_up(M, 256))


def _resident_bytes(tm, C, Hp, x_it, w_it):
    xio = 2 * 2 * tm * C * x_it                  # x + out, double-buffered
    wts = 2 * (C * Hp + Hp * C) * w_it           # weights (budgeted at 2x)
    bias = 4 * (Hp + C) * w_it
    interm = tm * Hp * 4 + tm * Hp * w_it        # f32 hidden + cast copy
    return xio + wts + bias + interm


def _tiled_bytes(tm, C, th, x_it, w_it):
    xio = 2 * 2 * tm * C * x_it
    acc = tm * C * 4
    wts = 2 * (C * th + th * C) * w_it           # double-buffered weight tiles
    bias = 4 * (th + C) * w_it
    interm = tm * th * 4 + tm * th * w_it
    return xio + acc + wts + bias + interm


def _choose_config(M, C, H, x_it, w_it, tm_req):
    cap, vmem_limit = _vmem_info()
    budget = int(vmem_limit * 0.85)              # safety margin inside the limit

    if tm_req is None:
        # 64-MiB-VMEM parts (v7x): tm=512.  128-MiB parts (v5e/v6e): tm=1024.
        tm_target = 512 if cap <= (64 << 20) else 1024
    else:
        tm_target = (_round_up(tm_req, 256) if tm_req >= 256
                     else _round_up(max(tm_req, 16), 16))

    tm = _pick_row_tile(M, tm_target)
    Hp_res = _round_up(H, 128)

    while True:
        if _resident_bytes(tm, C, Hp_res, x_it, w_it) <= budget:
            return "resident", tm, None, Hp_res, vmem_limit
        for th in (512, 256, 128):               # keep th >= 256 when possible
            if th > Hp_res:
                continue
            if _tiled_bytes(tm, C, th, x_it, w_it) <= budget:
                return "tiled", tm, th, _round_up(H, th), vmem_limit
        if tm <= 16:
            return "tiled", 16, 128, _round_up(H, 128), vmem_limit
        tm = max(16, tm // 2)


# ---------------------------------------------------------------------------
# Wrapper
# ---------------------------------------------------------------------------

@functools.partial(jax.jit, static_argnames=("tm", "approx_gelu", "matmul_dtype"))
def mlp_pallas(x, w1, b1, w2, b2, *, tm=None, approx_gelu=False, matmul_dtype=None):
    """MLP forward.  x: (B, T, C); W1: (C, 4C); W2: (4C, C) (torch W.T)."""
    B, T, C = x.shape
    H = w1.shape[1]
    M = B * T
    x_it = jnp.dtype(x.dtype).itemsize
    w_it = jnp.dtype(w1.dtype).itemsize

    mode, tm, th, Hp, vmem_limit = _choose_config(M, C, H, x_it, w_it, tm)

    Mp = _round_up(M, tm)                        # pad ragged M to the row tile
    x2 = x.reshape(M, C)
    if Mp != M:
        x2 = jnp.pad(x2, ((0, Mp - M), (0, 0)))

    # Pad the hidden dim to the tile (zero-padded W1 columns / b1 entries /
    # W2 rows contribute exactly 0 to the output).
    w1p, w2p = w1, w2
    b1_2 = b1.reshape(1, H)
    if Hp != H:
        w1p = jnp.pad(w1, ((0, 0), (0, Hp - H)))
        w2p = jnp.pad(w2, ((0, Hp - H), (0, 0)))
        b1_2 = jnp.pad(b1_2, ((0, 0), (0, Hp - H)))
    b2_2 = b2.reshape(1, C)

    n_row_tiles = Mp // tm
    w_bytes = w1p.size * w1p.dtype.itemsize + w2p.size * w2p.dtype.itemsize
    b_bytes = b1_2.size * b1_2.dtype.itemsize + b2_2.size * b2_2.dtype.itemsize
    weight_reads = 1 if mode == "resident" else n_row_tiles
    cost = pl.CostEstimate(
        flops=4 * Mp * C * Hp,
        transcendentals=Mp * Hp,
        bytes_accessed=int(2 * Mp * C * x_it + weight_reads * w_bytes + b_bytes))

    if mode == "resident":
        kernel = functools.partial(_mlp_kernel_resident,
                                   approx_gelu=approx_gelu,
                                   matmul_dtype=matmul_dtype)
        grid_spec = pltpu.PrefetchScalarGridSpec(
            num_scalar_prefetch=0,
            grid=(n_row_tiles,),
            in_specs=[
                pl.BlockSpec((tm, C), lambda i: (i, 0)),
                # Constant-index weight/bias blocks: DMA'd once, single-buffered.
                pl.BlockSpec((C, Hp), lambda i: (0, 0), pipeline_mode=pl.Buffered(1)),
                pl.BlockSpec((1, Hp), lambda i: (0, 0), pipeline_mode=pl.Buffered(1)),
                pl.BlockSpec((Hp, C), lambda i: (0, 0), pipeline_mode=pl.Buffered(1)),
                pl.BlockSpec((1, C),  lambda i: (0, 0), pipeline_mode=pl.Buffered(1)),
            ],
            out_specs=pl.BlockSpec((tm, C), lambda i: (i, 0)),
            scratch_shapes=[],
        )
        dim_sem = ("parallel",)
    else:
        kernel = functools.partial(_mlp_kernel_tiled,
                                   approx_gelu=approx_gelu,
                                   matmul_dtype=matmul_dtype)
        grid_spec = pltpu.PrefetchScalarGridSpec(
            num_scalar_prefetch=0,
            grid=(n_row_tiles, Hp // th),
            in_specs=[
                pl.BlockSpec((tm, C), lambda i, k: (i, 0)),   # x row tile
                pl.BlockSpec((C, th), lambda i, k: (0, k)),   # W1 hidden tile
                pl.BlockSpec((1, th), lambda i, k: (0, k)),   # b1 hidden tile
                pl.BlockSpec((th, C), lambda i, k: (k, 0)),   # W2 hidden tile
                pl.BlockSpec((1, C),  lambda i, k: (0, 0)),   # b2 (full)
            ],
            out_specs=pl.BlockSpec((tm, C), lambda i, k: (i, 0)),
            scratch_shapes=[pltpu.VMEM((tm, C), jnp.float32)],
        )
        dim_sem = ("parallel", "arbitrary")

    out = pl.pallas_call(
        kernel,
        out_shape=jax.ShapeDtypeStruct((Mp, C), x.dtype),
        grid_spec=grid_spec,
        compiler_params=pltpu.CompilerParams(
            dimension_semantics=dim_sem,
            vmem_limit_bytes=int(vmem_limit)),
        cost_estimate=cost,
    )(x2, w1p, b1_2, w2p, b2_2)

    if Mp != M:
        out = out[:M]
    return out.reshape(B, T, C)


# ---------------------------------------------------------------------------
# Reference + test
# ---------------------------------------------------------------------------

def init_mlp_params(key, n_embd, dtype=jnp.float32):
    """Deterministic synthetic parameters (shapes match the PyTorch module)."""
    k1, k2, k3, k4 = jax.random.split(key, 4)
    hidden = 4 * n_embd
    scale_fc = 1.0 / math.sqrt(n_embd)
    scale_proj = 1.0 / math.sqrt(hidden)
    # Stored transposed relative to torch so the kernel computes x @ W.
    w1 = (jax.random.normal(k1, (n_embd, hidden)) * scale_fc).astype(dtype)
    b1 = (jax.random.normal(k2, (hidden,)) * 0.01).astype(dtype)
    w2 = (jax.random.normal(k3, (hidden, n_embd)) * scale_proj).astype(dtype)
    b2 = (jax.random.normal(k4, (n_embd,)) * 0.01).astype(dtype)
    return w1, b1, w2, b2


def mlp_ref(x, w1, b1, w2, b2):
    xf, w1f, b1f, w2f, b2f = (a.astype(jnp.float32) for a in (x, w1, b1, w2, b2))
    h = xf @ w1f + b1f
    h = 0.5 * h * (1.0 + lax.erf(h * _INV_SQRT2))
    return h @ w2f + b2f


if __name__ == "__main__":
    # config: n_embd=32, bias=True, dropout=0.0 (identity in eval)
    batch, seq, n_embd = 2, 8, 32

    key = jax.random.PRNGKey(0)
    kx, kp = jax.random.split(key)
    x = jax.random.normal(kx, (batch, seq, n_embd), dtype=jnp.float32)
    w1, b1, w2, b2 = init_mlp_params(kp, n_embd, dtype=jnp.float32)

    # f32 path (exact erf GELU, f32 matmuls).
    out = jax.block_until_ready(mlp_pallas(x, w1, b1, w2, b2))
    ref = mlp_ref(x, w1, b1, w2, b2)
    assert out.shape == (batch, seq, n_embd)
    assert jnp.allclose(out, ref, atol=1e-4, rtol=1e-4), "f32 mismatch"

    # Ragged row count (exercises the pad-to-tile path).
    x_r = x[:, :7]
    out_r = jax.block_until_ready(mlp_pallas(x_r, w1, b1, w2, b2))
    ref_r = mlp_ref(x_r, w1, b1, w2, b2)
    assert jnp.allclose(out_r, ref_r, atol=1e-4, rtol=1e-4), "ragged mismatch"

    # bf16 operands: native-MXU bf16 path with f32 accumulation in-kernel.
    # (GELU input is downcast to bf16 before the second matmul; covered by tol.)
    xb = x.astype(jnp.bfloat16)
    w1b, b1b, w2b, b2b = (a.astype(jnp.bfloat16) for a in (w1, b1, w2, b2))
    out_b = jax.block_until_ready(mlp_pallas(xb, w1b, b1b, w2b, b2b))
    ref_b = mlp_ref(xb, w1b, b1b, w2b, b2b)
    assert jnp.allclose(out_b.astype(jnp.float32), ref_b,
                        atol=5e-2, rtol=5e-2), "bf16 mismatch"

    # Opt-in fast paths: tanh-approx GELU + bf16 MXU matmuls for f32 inputs.
    out_f = jax.block_until_ready(
        mlp_pallas(x, w1, b1, w2, b2, approx_gelu=True, matmul_dtype=jnp.bfloat16))
    assert jnp.allclose(out_f, ref, atol=5e-2, rtol=5e-2), "fast-path mismatch"

    print("KERNEL_OK")
</pallas_src>

<mosaic_0001>
module attributes {stable_mosaic.version = 11 : i64} {
  func.func @_mlp_kernel_resident(%arg0: i32, %arg1: memref<16x32xf32, #tpu.memory_space<vmem>>, %arg2: memref<32x128xf32, #tpu.memory_space<vmem>>, %arg3: memref<1x128xf32, #tpu.memory_space<vmem>>, %arg4: memref<128x32xf32, #tpu.memory_space<vmem>>, %arg5: memref<1x32xf32, #tpu.memory_space<vmem>>, %arg6: memref<16x32xf32, #tpu.memory_space<vmem>>) attributes {dimension_semantics = [#tpu.dimension_semantics<parallel>], iteration_bounds = array<i64: 1>, scalar_prefetch = 0 : i64, scratch_operands = 0 : i64, tpu.core_type = #tpu.core_type<tc>, window_params = [{transform_indices = @transform_0, window_bounds = array<i64: 16, 32>}, {pipeline_mode = #tpu.pipeline_mode<synchronous>, transform_indices = @transform_1, window_bounds = array<i64: 32, 128>}, {pipeline_mode = #tpu.pipeline_mode<synchronous>, transform_indices = @transform_2, window_bounds = array<i64: 1, 128>}, {pipeline_mode = #tpu.pipeline_mode<synchronous>, transform_indices = @transform_3, window_bounds = array<i64: 128, 32>}, {pipeline_mode = #tpu.pipeline_mode<synchronous>, transform_indices = @transform_4, window_bounds = array<i64: 1, 32>}, {transform_indices = @transform_5, window_bounds = array<i64: 16, 32>}]} {
    %c0 = arith.constant 0 : index
    %c0_0 = arith.constant 0 : index
    %0 = vector.load %arg1[%c0, %c0_0] : memref<16x32xf32, #tpu.memory_space<vmem>>, vector<16x32xf32>
    %c0_1 = arith.constant 0 : index
    %c0_2 = arith.constant 0 : index
    %1 = vector.load %arg2[%c0_1, %c0_2] : memref<32x128xf32, #tpu.memory_space<vmem>>, vector<32x128xf32>
    %cst = arith.constant dense<0.000000e+00> : vector<16x128xf32>
    %2 = tpu.matmul %0, %1, %cst {dimension_numbers = #tpu.dot_dimension_numbers<[1], [0], [0], [1], [0, 0, 1, 1], [], []>} : vector<16x32xf32>, vector<32x128xf32>, vector<16x128xf32> -> vector<16x128xf32>
    %c0_3 = arith.constant 0 : index
    %c0_4 = arith.constant 0 : index
    %3 = vector.load %arg3[%c0_3, %c0_4] : memref<1x128xf32, #tpu.memory_space<vmem>>, vector<1x128xf32>
    %4 = vector.broadcast %3 : vector<1x128xf32> to vector<16x128xf32>
    %5 = arith.addf %2, %4 : vector<16x128xf32>
    %cst_5 = arith.constant 5.000000e-01 : f32
    %6 = vector.broadcast %cst_5 : f32 to vector<16x128xf32>
    %7 = arith.mulf %6, %5 : vector<16x128xf32>
    %cst_6 = arith.constant 0.707106769 : f32
    %8 = vector.broadcast %cst_6 : f32 to vector<16x128xf32>
    %9 = arith.mulf %5, %8 : vector<16x128xf32>
    %10 = math.erf %9 : vector<16x128xf32>
    %cst_7 = arith.constant 1.000000e+00 : f32
    %11 = vector.broadcast %cst_7 : f32 to vector<16x128xf32>
    %12 = arith.addf %11, %10 : vector<16x128xf32>
    %13 = arith.mulf %7, %12 : vector<16x128xf32>
    %c0_8 = arith.constant 0 : index
    %c0_9 = arith.constant 0 : index
    %14 = vector.load %arg4[%c0_8, %c0_9] : memref<128x32xf32, #tpu.memory_space<vmem>>, vector<128x32xf32>
    %cst_10 = arith.constant dense<0.000000e+00> : vector<16x32xf32>
    %15 = tpu.matmul %13, %14, %cst_10 {dimension_numbers = #tpu.dot_dimension_numbers<[1], [0], [0], [1], [0, 0, 1, 1], [], []>} : vector<16x128xf32>, vector<128x32xf32>, vector<16x32xf32> -> vector<16x32xf32>
    %c0_11 = arith.constant 0 : index
    %c0_12 = arith.constant 0 : index
    %16 = vector.load %arg5[%c0_11, %c0_12] : memref<1x32xf32, #tpu.memory_space<vmem>>, vector<1x32xf32>
    %17 = vector.broadcast %16 : vector<1x32xf32> to vector<16x32xf32>
    %18 = arith.addf %15, %17 : vector<16x32xf32>
    %c0_13 = arith.constant 0 : index
    %c0_14 = arith.constant 0 : index
    %19 = vector.load %arg6[%c0_13, %c0_14] : memref<16x32xf32, #tpu.memory_space<vmem>>, vector<16x32xf32>
    tpu.vector_store %arg6[%c0_13, %c0_14], %18 {strides = array<i32>} : memref<16x32xf32, #tpu.memory_space<vmem>>, vector<16x32xf32>,
    return
  }
  func.func @transform_0(%arg0: i32) -> (i32, i32) {
    %c0_i32 = arith.constant 0 : i32
    %c0_i32_0 = arith.constant 0 : i32
    return %arg0, %c0_i32 : i32, i32
  }
  func.func @transform_1(%arg0: i32) -> (i32, i32) {
    %c0_i32 = arith.constant 0 : i32
    %c0_i32_0 = arith.constant 0 : i32
    %c0_i32_1 = arith.constant 0 : i32
    return %c0_i32, %c0_i32_0 : i32, i32
  }
  func.func @transform_2(%arg0: i32) -> (i32, i32) {
    %c0_i32 = arith.constant 0 : i32
    %c0_i32_0 = arith.constant 0 : i32
    %c0_i32_1 = arith.constant 0 : i32
    return %c0_i32, %c0_i32_0 : i32, i32
  }
  func.func @transform_3(%arg0: i32) -> (i32, i32) {
    %c0_i32 = arith.constant 0 : i32
    %c0_i32_0 = arith.constant 0 : i32
    %c0_i32_1 = arith.constant 0 : i32
    return %c0_i32, %c0_i32_0 : i32, i32
  }
  func.func @transform_4(%arg0: i32) -> (i32, i32) {
    %c0_i32 = arith.constant 0 : i32
    %c0_i32_0 = arith.constant 0 : i32
    %c0_i32_1 = arith.constant 0 : i32
    return %c0_i32, %c0_i32_0 : i32, i32
  }
  func.func @transform_5(%arg0: i32) -> (i32, i32) {
    %c0_i32 = arith.constant 0 : i32
    %c0_i32_0 = arith.constant 0 : i32
    return %arg0, %c0_i32 : i32, i32
  }
}

</mosaic_0001>

<bundles_post_ra>
// kernel: mlp_pallas.1
= control target key start
LH: loop header
LB: loop body
LE: loop exit
PB: predicated region body
PF: predicated region fallthrough
CT: control target
= control target key end

     0   :  { %vm34_vm0 = vcmask 261120   ;;  %s508_s0 = inlined_call_operand.vmem [shape: f32[16,32], index: 0, kind: input, shape index: {}]   ;;  %s509_s1 = inlined_call_operand.vmem [shape: f32[32,128], index: 1, kind: input, shape index: {}]   ;;  %s510_s2 = inlined_call_operand.vmem [shape: f32[1,128], index: 2, kind: input, shape index: {}]   ;;  %s511_s3 = inlined_call_operand.vmem [shape: f32[128,32], index: 3, kind: input, shape index: {}]   ;;  %s512_s4 = inlined_call_operand.vmem [shape: f32[1,32], index: 4, kind: input, shape index: {}]   ;;  %s513_s5 = inlined_call_operand.hbm [shape: f32[16,32], index: 5, kind: output, shape index: {}]  }
   0x1   :  { %v23_v0 = vld [vmem:[%s509_s1] sm:$0xff]  ;;  %v24_v1 = vld [vmem:[%s509_s1 + $0x8] sm:$0xff]  ;;  %v25_v2 = vld [vmem:[%s509_s1 + $0x10] sm:$0xff] }
   0x2   :  { %v316_v3 = vpack.c.bf16 %v24_v1, %v23_v0  ;;  %v26_v4 = vld [vmem:[%s509_s1 + $0x18] sm:$0xff]  ;;  %v21_v5 = vld [vmem:[%s508_s0] sm:$0xff]  ;;  %v127_v8 = vld [vmem:[%s511_s3 + $0x8] sm:$0xff] }
   0x3   :  { %v320_v6 = vpack.c.bf16 %v26_v4, %v25_v2  ;;  %278 = vmatprep.mubr.msk.f32.mxu0 %vm34_vm0, %v21_v5  ;;  %v126_v7 = vld [vmem:[%s511_s3] sm:$0xff]  ;;  %v128_v9 = vld [vmem:[%s511_s3 + $0x10] sm:$0xff]  ;;  %v129_v11 = vld [vmem:[%s511_s3 + $0x18] sm:$0xff] }
   0x4   :  { %317 = vmatprep.subr.bf16.mxu0 %v316_v3  ;;  %v324_v10 = vpack.c.bf16 %v127_v8, %v126_v7  ;;  %v328_v12 = vpack.c.bf16 %v129_v11, %v128_v9  ;;  %v130_v13 = vld [vmem:[%s511_s3 + $0x20] sm:$0xff]  ;;  %v131_v14 = vld [vmem:[%s511_s3 + $0x28] sm:$0xff] }
   0x5   :  { %319 = vmatpush3.bf16.msra.mxu0 %v316_v3 }
   0x6   :  { %10 = vsyncpa [#allocation3], 0  ;;  %321 = vmatprep.subr.bf16.mxu0 %v320_v6  ;;  %325 = vmatprep.subr.bf16.mxu1 %v324_v10  ;;  %v332_v15 = vpack.c.bf16 %v131_v14, %v130_v13  ;;  %v22_v16 = vld [vmem:[%s508_s0 + $0x8] sm:$0xff]  ;;  %v132_v17 = vld [vmem:[%s511_s3 + $0x30] sm:$0xff]  ;;  %s387_s11 = smov [#allocation2]  }
   0x7   :  { %327 = vmatpush3.bf16.msra.mxu1 %v324_v10  ;;  %v133_v18 = vld [vmem:[%s511_s3 + $0x38] sm:$0xff]  ;;  %v134_v20 = vld [vmem:[%s511_s3 + $0x40] sm:$0xff]  ;;  %v135_v21 = vld [vmem:[%s511_s3 + $0x48] sm:$0xff]  ;;  %s231_s12 = sshll.u32 %s387_s11, 4  ;;  %s232_s12 = int_to_ptr.vmem [resolvable:$true] %s231_s12 }
   0x8   :  { %329 = vmatprep.subr.bf16.mxu1 %v328_v12  ;;  %v336_v19 = vpack.c.bf16 %v133_v18, %v132_v17  ;;  %v340_v22 = vpack.c.bf16 %v135_v21, %v134_v20  ;;  %v136_v23 = vld [vmem:[%s511_s3 + $0x50] sm:$0xff]  ;;  %v137_v24 = vld [vmem:[%s511_s3 + $0x58] sm:$0xff]  ;;  %v138_v26 = vld [vmem:[%s511_s3 + $0x60] sm:$0xff]  ;;  %s363_s13 = scalar_lea.vmem %s232_s12, 256  ;;  %p368_p1 = scmp.lt.s32.totalorder %s232_s12, %s232_s12 }
   0x9   :  { %323 = vmatpush3.bf16.msra.mxu0 %v320_v6  ;;  %v344_v25 = vpack.c.bf16 %v137_v24, %v136_v23  ;;  %v139_v27 = vld [vmem:[%s511_s3 + $0x68] sm:$0xff]  ;;  %v140_v29 = vld [vmem:[%s511_s3 + $0x70] sm:$0xff]  ;;  %v141_v30 = vld [vmem:[%s511_s3 + $0x78] sm:$0xff]  ;;  %p364_p0 = scmp.ne.s32.totalorder %s232_s12, %s363_s13  ;;  %p369_p2 = scmp.lt.s32.totalorder %s363_s13, %s363_s13 }
   0xa   :  { %v348_v28 = vpack.c.bf16 %v139_v27, %v138_v26  ;;  %v352_v31 = vpack.c.bf16 %v141_v30, %v140_v29  ;;  %v242_v32 = vld [vmem:[%s510_s2] ss:$0 sm:$0xff] }
   0xb   :  { %331 = vmatpush3.bf16.msra.mxu1 %v328_v12  ;;  %v245_v47 = vld [vmem:[%s512_s4] ss:$0 sm:$0xff]  ;;  %p370_p3 = por %p369_p2, %p368_p1 }
   0xc   :  { %279 = vmatmul.mubr.msk.f32.vlgmr.msra.gmra.mrb[0].mxu0 %vm34_vm0, %v22_v16  ;;  %333 = vmatprep.subr.bf16.mxu1 %v332_v15 }
   0xd   :  { %p371_p4 = pnand %p370_p3, %p364_p0 }
   0xf   :  { %335 = vmatpush3.bf16.msra.mxu1 %v332_v15 }
  0x10   :  { %337 = vmatprep.subr.bf16.mxu1 %v336_v19 }
  0x13   :  { %339 = vmatpush3.bf16.msra.mxu1 %v336_v19 }
  0x14   :  { %341 = vmatprep.subr.bf16.mxu1 %v340_v22 }
  0x17   :  { %343 = vmatpush3.bf16.msra.mxu1 %v340_v22 }
  0x18   :  { %345 = vmatprep.subr.bf16.mxu1 %v344_v25 }
  0x1b   :  { %347 = vmatpush3.bf16.msra.mxu1 %v344_v25 }
  0x1c   :  { %349 = vmatprep.subr.bf16.mxu1 %v348_v28 }
  0x1f   :  { %351 = vmatpush3.bf16.msra.mxu1 %v348_v28 }
  0x20   :  { %353 = vmatprep.subr.bf16.mxu1 %v352_v31 }
  0x23   :  { %355 = vmatpush3.bf16.msra.mxu1 %v352_v31 }
  0xdf   :  { %v280_v33 = vpop.f32.mrb[0].mxu0 }
  0xe0   :  { %v113_v34 = vadd.f32 %v280_v33, %v242_v32  ;;  %v107_v35 = vpop.f32.mrb[1].mxu0 }
  0xe1   :  { %v108_v36 = vadd.f32 %v242_v32, %v107_v35 }
  0xe2   :  { %v119_v37 = vmul.f32 0.70710677, %v113_v34  ;;  %v117_v44 = vmul.f32 0.5, %v113_v34 }
  0xe3   :  { %v118_v38 = vmul.f32 0.70710677, %v108_v36  ;;  %v116_v42 = vmul.f32 0.5, %v108_v36 }
  0xe4   :  { %359 = verf.f32 %v119_v37 }
  0xe5   :  { %361 = verf.f32 %v118_v38 }
  0xee   :  { %v360_v39 = vpop.eup %359 }
  0xef   :  { %v362_v40 = vpop.eup %361  ;;  %v123_v41 = vadd.f32 1.0, %v360_v39 }
  0xf0   :  { %v122_v43 = vadd.f32 1.0, %v362_v40 }
  0xf1   :  { %v125_v46 = vmul.f32 %v123_v41, %v117_v44 }
  0xf2   :  { %v124_v45 = vmul.f32 %v122_v43, %v116_v42 }
  0xf4   :  { %313 = vmatprep.mubr.f32.mxu1 %v124_v45 }
  0xf5   :  { %314 = vmatmul.mubr.f32.vlgmr.msra.gmra.mrb[0].mxu1 %v125_v46 }
 0x1c8   :  { %v315_v48 = vpop.f32.mrb[0].mxu1 }
 0x1c9   :  { %v221_v49 = vadd.f32 %v315_v48, %v245_v47  ;;  %v215_v50 = vpop.f32.mrb[1].mxu1 }
 0x1ca   :  { %v216_v51 = vadd.f32 %v245_v47, %v215_v50 }
 0x1cb   :  { %225 = vst.msk [vmem:[#allocation2 + $0x8] sm:$0xff] %vm34_vm0, %v221_v49 }
 0x1cc   :  { %224 = vst.msk [vmem:[#allocation2] sm:$0xff] %vm34_vm0, %v216_v51 }
 0x1cd   :  { %374 = shalt.err (!%p371_p4)
}
 0x1ce   :  { %s375_s15 = scalar_lea.hbm %s513_s5, 256 }
 0x1cf   :  { %p376_p5 = scmp.ne.s32.totalorder %s513_s5, %s375_s15  ;;  %p379_p6 = scmp.lt.u32.totalorder %s375_s15, %s513_s5 }
 0x1d1   :  { %p381_p7 = pnand %p379_p6, %p376_p5 }
 0x1d3   :  { %384 = shalt.err (!%p381_p7)
}
 0x1d4   :  { %s388_s20 = smov 128   ;;  %s389_s21 = smov 8  }
 0x1d5   :  { %237 = dma.vmem_to_hbm [thread:$0]  %s232_s12, 256, %s513_s5, [#allocation3], %s388_s20, %s388_s20, %s389_s21  }
 0x1d6   :  { %385 = dma.done.wait [#allocation3], 256  }
 0x1d7   :  { %386 = vsyncadd [#allocation3], 4294967040 }
 0x1d8   :  { %241 = vsyncpa [#allocation3], 1 }

</bundles_post_ra>
